<compile_context>
chip_gen: v6e
topology: v6e:2x2x1
jax: 0.10.0
libtpu: 0.0.40
codegen_flags: <defaults>
</compile_context>

<pallas_src>
import functools

import jax
import jax.numpy as jnp
from jax.experimental import pallas as pl
from jax.experimental.pallas import tpu as pltpu

RADIUS = 1.0

_LANE = 128
_MiB = 1024 * 1024


def _round_up(x, m):
    return ((x + m - 1) // m) * m


def _sublane_multiple(dtype):
    # f32 -> 8, bf16/f16 -> 16, int8/fp8 -> 32 (sub-32-bit dtypes pack along sublanes)
    itemsize = jnp.dtype(dtype).itemsize
    return max(8, 32 // max(1, itemsize))


@functools.lru_cache(maxsize=1)
def _hw_config():
    """Generation-dependent VMEM limit, fast-path crossover and block targets."""
    vmem_phys = 64 * _MiB  # conservative default (v7x per-TC)
    try:
        info = pltpu.get_tpu_info()
        vmem_phys = int(getattr(info, "vmem_capacity_bytes", vmem_phys))
    except Exception:
        pass
    if vmem_phys >= 96 * _MiB:
        # v5e / v6e: 128 MiB physical VMEM -> keep the 2x-traffic single pass alive
        # much longer before falling back to the 3x-traffic two-pass path.
        return dict(
            vmem_limit=100 * _MiB,
            two_pass_threshold=84 * _MiB,
            fast_block=8 * _MiB,
            sq_block=32 * _MiB,
            scale_block=8 * _MiB,
        )
    # v7x: 64 MiB physical per TensorCore -- leave the compiler headroom.
    return dict(
        vmem_limit=48 * _MiB,
        two_pass_threshold=38 * _MiB,
        fast_block=8 * _MiB,
        sq_block=16 * _MiB,
        scale_block=8 * _MiB,
    )


# --------------------------------------------------------------------------- #
# Fast path: full feature dim resident in one (TB, D) block, batch tiled.
# --------------------------------------------------------------------------- #
def _l2_sphere_kernel(x_ref, o_ref, *, radius):
    # Block: (TB, D). Reduce over the lane (last) axis in f32, then re-read the
    # input for the scale so the upcast tile is not kept live across the
    # reduction (less vreg pressure / spill traffic for packed dtypes).
    xf = x_ref[...].astype(jnp.float32)
    sq = jnp.sum(xf * xf, axis=-1, keepdims=True)         # (TB, 1)
    inv = jax.lax.rsqrt(sq)                                # EUP slot; free under the DMA
    o_ref[...] = (x_ref[...].astype(jnp.float32) * (radius * inv)).astype(o_ref.dtype)


def _project_fast(x2d, radius, cfg):
    b, d = x2d.shape
    itemsize = jnp.dtype(x2d.dtype).itemsize
    sub = _sublane_multiple(x2d.dtype)
    total_bytes = b * d * itemsize

    # ~8 MiB tall blocks (amortizes ~0.35 us per grid step), TB a multiple of the
    # sublane packing (or TB == B for tiny batches).
    rows = (cfg["fast_block"] // max(1, d * itemsize)) // sub * sub
    rows = max(sub, rows)

    # Keep enough grid steps for software pipelining and (on v7x) megacore
    # sharding when the problem is big enough to care.
    target_steps = 1
    if b >= 2 * sub:
        target_steps = 2
        if total_bytes > 4 * _MiB and b >= 4 * sub:
            target_steps = 4
    if target_steps > 1:
        rows = min(rows, max(sub, _round_up(pl.cdiv(b, target_steps), sub)))

    tb = b if rows >= b else rows

    kernel = functools.partial(_l2_sphere_kernel, radius=radius)
    return pl.pallas_call(
        kernel,
        out_shape=jax.ShapeDtypeStruct((b, d), x2d.dtype),
        grid_spec=pltpu.PrefetchScalarGridSpec(
            num_scalar_prefetch=0,
            grid=(pl.cdiv(b, tb),),
            in_specs=[pl.BlockSpec((tb, d), lambda i: (i, 0))],
            out_specs=pl.BlockSpec((tb, d), lambda i: (i, 0)),
        ),
        compiler_params=pltpu.CompilerParams(
            dimension_semantics=("parallel",),     # rows independent -> shard across TCs
            vmem_limit_bytes=cfg["vmem_limit"],
        ),
        # NOTE: no input_output_aliases -- callers do not donate x, so aliasing
        # would only trigger a hidden defensive HBM copy (or clobber live data).
    )(x2d)


# --------------------------------------------------------------------------- #
# Fallback for very large D: two passes over a (batch, feature)-tiled grid.
#   pass 1: accumulate per-row squared norm   pass 2: re-read x and scale
# --------------------------------------------------------------------------- #
def _sqnorm_kernel(x_ref, sq_ref, *, d_total, td):
    k = pl.program_id(1)

    @pl.when(k == 0)
    def _():
        sq_ref[...] = jnp.zeros_like(sq_ref)

    x = x_ref[...].astype(jnp.float32)
    # Mask the ragged last feature tile (boundary block contents are unspecified).
    col = jax.lax.broadcasted_iota(jnp.int32, x.shape, 1) + k * td
    x = jnp.where(col < d_total, x, 0.0)
    sq_ref[...] += jnp.sum(x * x, axis=-1, keepdims=True)


def _scale_kernel(x_ref, sq_ref, o_ref, *, radius):
    # NOTE: the ragged last feature tile is intentionally left unmasked here;
    # garbage lanes only produce garbage in lanes that Pallas clips on writeback.
    inv = jax.lax.rsqrt(sq_ref[...])                       # (TB, 1) broadcast over lanes
    o_ref[...] = (x_ref[...].astype(jnp.float32) * (radius * inv)).astype(o_ref.dtype)


def _project_two_pass(x2d, radius, cfg):
    b, d = x2d.shape
    itemsize = jnp.dtype(x2d.dtype).itemsize
    sub = _sublane_multiple(x2d.dtype)

    tb = b if b <= sub else sub

    def feature_tile(target_bytes):
        # Lane-dense feature tile (multiple of 128) sized to ~target_bytes.
        td = (target_bytes // max(1, tb * itemsize)) // _LANE * _LANE
        td = max(_LANE, td)
        return min(td, pl.cdiv(d, _LANE) * _LANE)

    # Pass 1 only double-buffers the input (accumulator is tiny) -> big tiles.
    td_sq = feature_tile(cfg["sq_block"])
    # Pass 2 has a 4x (in + out, double-buffered) footprint -> smaller tiles.
    td_sc = feature_tile(cfg["scale_block"])

    sq = pl.pallas_call(
        functools.partial(_sqnorm_kernel, d_total=d, td=td_sq),
        out_shape=jax.ShapeDtypeStruct((b, 1), jnp.float32),
        grid_spec=pltpu.PrefetchScalarGridSpec(
            num_scalar_prefetch=0,
            grid=(pl.cdiv(b, tb), pl.cdiv(d, td_sq)),
            in_specs=[pl.BlockSpec((tb, td_sq), lambda i, k: (i, k))],
            out_specs=pl.BlockSpec((tb, 1), lambda i, k: (i, 0)),   # accumulator across k
        ),
        compiler_params=pltpu.CompilerParams(
            dimension_semantics=("parallel", "arbitrary"),          # reduction axis last
            vmem_limit_bytes=cfg["vmem_limit"],
        ),
    )(x2d)

    return pl.pallas_call(
        functools.partial(_scale_kernel, radius=radius),
        out_shape=jax.ShapeDtypeStruct((b, d), x2d.dtype),
        grid_spec=pltpu.PrefetchScalarGridSpec(
            num_scalar_prefetch=0,
            grid=(pl.cdiv(b, tb), pl.cdiv(d, td_sc)),
            in_specs=[pl.BlockSpec((tb, td_sc), lambda i, k: (i, k)),
                      pl.BlockSpec((tb, 1), lambda i, k: (i, 0))],
            out_specs=pl.BlockSpec((tb, td_sc), lambda i, k: (i, k)),
        ),
        compiler_params=pltpu.CompilerParams(
            dimension_semantics=("parallel", "parallel"),
            vmem_limit_bytes=cfg["vmem_limit"],
        ),
    )(x2d, sq)


# --------------------------------------------------------------------------- #
# Public wrapper
# --------------------------------------------------------------------------- #
def euclidean_projection(x, radius=RADIUS, force_two_pass=False):
    """Forward pass of EuclideanProjection with an L2-sphere method.

    Accepts NCHW (B, C, H, W) or already-flat (B, D) inputs; returns the same
    shape/dtype as the input. Zero-norm rows produce inf/NaN (no eps guard),
    matching radius * x / ||x||.
    """
    orig_shape = x.shape
    b = orig_shape[0]
    x2d = x.reshape(b, -1)                                 # (B, D) glue reshape
    d = x2d.shape[1]
    cfg = _hw_config()

    # Pad small/awkward feature dims to a multiple of 128 (zeros don't change the
    # L2 norm) so output stores stay unmasked and lane-dense; skip for large D
    # where the extra pad copy would cost more than masked stores.
    d_pad = 0
    if d % _LANE != 0 and d <= 16 * _LANE:
        d_pad = _round_up(d, _LANE) - d
        x2d = jnp.pad(x2d, ((0, 0), (0, d_pad)))

    itemsize = jnp.dtype(x2d.dtype).itemsize
    sub = _sublane_multiple(x2d.dtype)
    dp = x2d.shape[1]
    # Minimum fast-path footprint: shortest legal row block, in + out, double buffered.
    min_fast_bytes = 4 * min(b, sub) * dp * itemsize

    if force_two_pass or min_fast_bytes > cfg["two_pass_threshold"]:
        # TODO(synk): for the boundary regime on v7x, pl.Buffered(1) on the fast-path
        # output would cut the footprint to 3x and extend single-pass reach further.
        out2d = _project_two_pass(x2d, radius, cfg)
    else:
        out2d = _project_fast(x2d, radius, cfg)

    if d_pad:
        out2d = out2d[:, :d]
    return out2d.reshape(orig_shape)


def _reference(x, radius=RADIUS):
    b = x.shape[0]
    x2d = x.reshape(b, -1).astype(jnp.float32)
    norm = jnp.sqrt(jnp.sum(x2d * x2d, axis=-1, keepdims=True))
    return (radius * x2d / norm).reshape(x.shape).astype(x.dtype)


if __name__ == "__main__":
    key = jax.random.PRNGKey(0)
    # NCHW input, small shapes: batch=2, channels=4, spatial=16x16.
    x = jax.random.normal(key, (2, 4, 16, 16), dtype=jnp.float32)

    ref = _reference(x)

    # Fast (batch-tiled, full-D) path.
    out = jax.block_until_ready(euclidean_projection(x))
    assert out.shape == x.shape and out.dtype == x.dtype
    assert jnp.allclose(out, ref, atol=1e-5, rtol=1e-5), "fast path mismatch vs reference"

    # Two-pass (D-tiled) fallback path, forced at small shapes for validation.
    out2 = jax.block_until_ready(euclidean_projection(x, force_two_pass=True))
    assert jnp.allclose(out2, ref, atol=1e-5, rtol=1e-5), "two-pass path mismatch vs reference"

    print("KERNEL_OK")
</pallas_src>

<mosaic_0001>
module attributes {stable_mosaic.version = 11 : i64} {
  func.func @_l2_sphere_kernel(%arg0: i32, %arg1: memref<2x1024xf32, #tpu.memory_space<vmem>>, %arg2: memref<2x1024xf32, #tpu.memory_space<vmem>>) attributes {dimension_semantics = [#tpu.dimension_semantics<parallel>], iteration_bounds = array<i64: 1>, scalar_prefetch = 0 : i64, scratch_operands = 0 : i64, tpu.core_type = #tpu.core_type<tc>, window_params = [{transform_indices = @transform_0, window_bounds = array<i64: 2, 1024>}, {transform_indices = @transform_1, window_bounds = array<i64: 2, 1024>}]} {
    %c0 = arith.constant 0 : index
    %c0_0 = arith.constant 0 : index
    %0 = vector.load %arg1[%c0, %c0_0] : memref<2x1024xf32, #tpu.memory_space<vmem>>, vector<2x1024xf32>
    %1 = arith.mulf %0, %0 : vector<2x1024xf32>
    %cst = arith.constant dense<0.000000e+00> : vector<2xf32>
    %2 = vector.multi_reduction <add>, %1, %cst [1] : vector<2x1024xf32> to vector<2xf32>
    %3 = vector.shape_cast %2 : vector<2xf32> to vector<2x1xf32>
    %4 = math.rsqrt %3 : vector<2x1xf32>
    %c0_1 = arith.constant 0 : index
    %c0_2 = arith.constant 0 : index
    %5 = vector.load %arg1[%c0_1, %c0_2] : memref<2x1024xf32, #tpu.memory_space<vmem>>, vector<2x1024xf32>
    %cst_3 = arith.constant 1.000000e+00 : f32
    %6 = vector.broadcast %cst_3 : f32 to vector<2x1xf32>
    %7 = arith.mulf %6, %4 : vector<2x1xf32>
    %8 = vector.broadcast %7 : vector<2x1xf32> to vector<2x1024xf32>
    %9 = arith.mulf %5, %8 : vector<2x1024xf32>
    %c0_4 = arith.constant 0 : index
    %c0_5 = arith.constant 0 : index
    %10 = vector.load %arg2[%c0_4, %c0_5] : memref<2x1024xf32, #tpu.memory_space<vmem>>, vector<2x1024xf32>
    tpu.vector_store %arg2[%c0_4, %c0_5], %9 {strides = array<i32>} : memref<2x1024xf32, #tpu.memory_space<vmem>>, vector<2x1024xf32>,
    return
  }
  func.func @transform_0(%arg0: i32) -> (i32, i32) {
    %c0_i32 = arith.constant 0 : i32
    %c0_i32_0 = arith.constant 0 : i32
    return %arg0, %c0_i32 : i32, i32
  }
  func.func @transform_1(%arg0: i32) -> (i32, i32) {
    %c0_i32 = arith.constant 0 : i32
    %c0_i32_0 = arith.constant 0 : i32
    return %arg0, %c0_i32 : i32, i32
  }
}

</mosaic_0001>

<bundles_post_ra>
// kernel: tpu_custom_call.1
= control target key start
LH: loop header
LB: loop body
LE: loop exit
PB: predicated region body
PF: predicated region fallthrough
CT: control target
= control target key end

     0   :  { %6 = vsyncpa [#allocation3], 0  ;;  %s194_s0 = inlined_call_operand.hbm [shape: f32[2,1024], index: 0, kind: input, shape index: {}]   ;;  %s195_s1 = inlined_call_operand.hbm [shape: f32[2,1024], index: 1, kind: output, shape index: {}]  }
   0x1   :  { %7 = vsyncpa [#allocation4], 0  ;;  %s166_s6 = smov [#allocation2]  }
   0x2   :  { %s14_s7 = sshll.u32 %s166_s6, 4  ;;  %s15_s7 = int_to_ptr.vmem [resolvable:$true] %s14_s7 }
   0x3   :  { %s130_s8 = scalar_lea.vmem %s15_s7, 256  ;;  %p135_p1 = scmp.lt.s32.totalorder %s15_s7, %s15_s7 }
   0x4   :  { %p131_p0 = scmp.ne.s32.totalorder %s15_s7, %s130_s8  ;;  %p136_p2 = scmp.lt.s32.totalorder %s130_s8, %s130_s8 }
   0x6   :  { %p137_p3 = por %p136_p2, %p135_p1 }
   0x8   :  { %p138_p4 = pnand %p137_p3, %p131_p0 }
   0xa   :  { %141 = shalt.err (!%p138_p4)
}
   0xb   :  { %17 = dma.hbm_to_vmem [thread:$0]  %s194_s0, 256, %s15_s7, [#allocation3]  }
   0xc   :  { %162 = dma.done.wait [#allocation3], 256  }
   0xd   :  { %163 = vsyncadd [#allocation3], 4294967040  ;;  %v31_v0 = vlaneseq  ;;  %v167_v1 = vmov 1983009808   ;;  %v21_v6 = vld [vmem:[#allocation2] sm:$0xff]  ;;  %v22_v7 = vld [vmem:[#allocation2 + $0x8] sm:$0xff] }
   0xe   :  { %v29_v2 = vunpack.c.l.s4 %v167_v1  ;;  %v23_v8 = vmul.f32 %v21_v6, %v21_v6  ;;  %v24_v9 = vmul.f32 %v22_v7, %v22_v7  ;;  %vm69_vm0 = vcmask 1041408   ;;  %s169_s0 = smov [#allocation5]  }
   0xf   :  { %v32_v3 = vshrl.u32 %v31_v0, 7  ;;  %v168_v36 = vmov 269488144   ;;  %s107_s11 = sshll.u32 %s169_s0, 4  ;;  %s108_s11 = int_to_ptr.vmem [resolvable:$true] %s107_s11 }
  0x10   :  { %v30_v4 = vunpack.c.0.s8 %v29_v2  ;;  %v27_v10 = vcombine.high %v23_v8, %v23_v8  ;;  %v44_v14 = vcombine.high %v24_v9, %v24_v9  ;;  %v90_v37 = vunpack.c.l.s4 %v168_v36  ;;  %s142_s12 = scalar_lea.vmem %s108_s11, 256  ;;  %p147_p6 = scmp.lt.s32.totalorder %s108_s11, %s108_s11 }
  0x11   :  { %p143_p5 = scmp.ne.s32.totalorder %s108_s11, %s142_s12  ;;  %p148_p7 = scmp.lt.s32.totalorder %s142_s12, %s142_s12 }
  0x12   :  { %v33_v5 = vsub.s32 %v30_v4, %v32_v3  ;;  %v91_v38 = vunpack.c.0.s8 %v90_v37 }
  0x13   :  { %p149_p8 = por %p148_p7, %p147_p6 }
  0x14   :  { %v34_v11 = vrot.slane %v23_v8, %v33_v5  ;;  %v41_v12 = vrot.slane %v27_v10, %v33_v5  ;;  %v51_v15 = vrot.slane %v24_v9, %v33_v5  ;;  %v58_v21 = vrot.slane %v44_v14, %v33_v5 }
  0x15   :  { %v94_v39 = vsub.s32 %v91_v38, %v32_v3  ;;  %p150_p9 = pnand %p149_p8, %p143_p5 }
  0x16   :  { %v42_v13 = vcombine.high %v34_v11, %v34_v11  ;;  %v70_v16 = vsel %vm69_vm0, %v34_v11, 0.0  ;;  %v43_v17 = vcombine.high %v41_v12, %v41_v12  ;;  %v73_v19 = vsel %vm69_vm0, %v41_v12, 0.0 }
  0x17   :  { %v59_v22 = vcombine.high %v51_v15, %v51_v15  ;;  %v77_v25 = vsel %vm69_vm0, %v51_v15, 0.0  ;;  %v60_v27 = vcombine.high %v58_v21, %v58_v21  ;;  %v81_v30 = vsel %vm69_vm0, %v58_v21, 0.0 }
  0x18   :  { %v71_v18 = vsel %vm69_vm0, %v42_v13, 0.0  ;;  %v75_v23 = vsel %vm69_vm0, %v43_v17, 0.0 }
  0x19   :  { %v72_v20 = vadd.f32 %v71_v18, %v70_v16  ;;  %v79_v28 = vsel %vm69_vm0, %v59_v22, 0.0  ;;  %v83_v32 = vsel %vm69_vm0, %v60_v27, 0.0 }
  0x1b   :  { %v74_v24 = vadd.f32 %v73_v19, %v72_v20 }
  0x1d   :  { %v76_v26 = vadd.f32 %v75_v23, %v74_v24 }
  0x1f   :  { %v78_v29 = vadd.f32 %v77_v25, %v76_v26 }
  0x21   :  { %v80_v31 = vadd.f32 %v79_v28, %v78_v29 }
  0x23   :  { %v82_v33 = vadd.f32 %v81_v30, %v80_v31 }
  0x25   :  { %v84_v34 = vadd.f32 %v83_v32, %v82_v33 }
  0x27   :  { %85 = vadd.xlane.f32.xlu0 %v84_v34 }
  0xb0   :  { %v86_v35 = vpop.xlane.xlu0 %85 }
  0xb1   :  { %120 = vrsqrt.f32 %v86_v35 }
  0xbe   :  { %v121_v40 = vpop.eup %120 }
  0xbf   :  { %v95_v41 = vrot.slane %v121_v40, %v94_v39 }
  0xc1   :  { %v97_v42 = vmul.f32 %v95_v41, %v21_v6  ;;  %v98_v43 = vmul.f32 %v95_v41, %v22_v7 }
  0xc3   :  { %99 = vst [vmem:[#allocation5] sm:$0xff] %v97_v42  ;;  %100 = vst [vmem:[#allocation5 + $0x8] sm:$0xff] %v98_v43 }
  0xc4   :  { %153 = shalt.err (!%p150_p9)
}
  0xc5   :  { %110 = dma.vmem_to_hbm [thread:$0]  %s108_s11, 256, %s195_s1, [#allocation4]  }
  0xc6   :  { %164 = dma.done.wait [#allocation4], 256  }
  0xc7   :  { %165 = vsyncadd [#allocation4], 4294967040 }
  0xc8   :  { %114 = vsyncpa [#allocation3], 1 }
  0xc9   :  { %115 = vsyncpa [#allocation4], 1 }

</bundles_post_ra>
